<compile_context>
chip_gen: v6e
topology: v6e:2x2x1
jax: 0.10.0
libtpu: 0.0.40
codegen_flags: <defaults>
</compile_context>

<pallas_src>
import functools

import jax
import jax.numpy as jnp
from jax.experimental import pallas as pl
from jax.experimental.pallas import tpu as pltpu


def fcn_kernel(x_ref, w_in_ref, b_in_ref, w_h_ref, b_h_ref,
               w_out_ref, b_out_ref, o_ref):
    # x_ref: (n_in, tb) -- batch on lanes.
    x = x_ref[...]
    if x_ref.shape[0] == 1:
        # K=1 contraction: outer product on the VPU, skip the degenerate MXU pass.
        # (H, 1) * (1, tb) + (H, 1) -> (H, tb)
        h = jnp.tanh(w_in_ref[...] * x + b_in_ref[...])
    else:
        h = jnp.tanh(
            jnp.dot(w_in_ref[...], x, preferred_element_type=jnp.float32)
            + b_in_ref[...]
        )

    # Hidden layers: (H, H) @ (H, tb) on the MXU, batch fills the free dim.
    # Static Python loop => fully unrolled, full LLO scheduler visibility.
    n_hidden_layers = w_h_ref.shape[0]
    for l in range(n_hidden_layers):
        h = jnp.tanh(
            jnp.dot(w_h_ref[l], h, preferred_element_type=jnp.float32)
            + b_h_ref[l]
        )

    # Output layer (no activation): (n_out, H) @ (H, tb) -> lane-dense (n_out, tb).
    o_ref[...] = (
        jnp.dot(w_out_ref[...], h, preferred_element_type=jnp.float32)
        + b_out_ref[...]
    )


def _choose_tb(B):
    """Lane-dense batch tile (multiple of 128), capped at 1024, and >=2 grid
    steps when the batch is big enough (keeps both v7x TensorCores busy)."""
    if B >= 2048:
        return 1024
    if B >= 256:
        return max(128, pl.next_power_of_2(B) // 2)
    return 128


@functools.partial(jax.jit, static_argnames=("tb",))
def fcn_forward(x, w_in, b_in, w_h, b_h, w_out, b_out, *, tb=None):
    """x: (B, n_in) row-major (PyTorch convention). Returns (B, n_out) f32."""
    B, n_in = x.shape
    n_out = w_out.shape[0]

    if tb is None:
        tb = _choose_tb(B)

    # Zero-pad batch to a tile multiple (padded columns are sliced off below).
    num_tiles = pl.cdiv(B, tb)
    B_pad = num_tiles * tb

    # Batch-on-lanes layout: (features, batch). For n_in == 1 this transpose is
    # effectively a reshape.
    xt = x.T
    if B_pad != B:
        xt = jnp.pad(xt, ((0, 0), (0, B_pad - B)))

    grid = (num_tiles,)

    out_t = pl.pallas_call(
        fcn_kernel,
        out_shape=jax.ShapeDtypeStruct((n_out, B_pad), jnp.float32),
        grid_spec=pltpu.PrefetchScalarGridSpec(
            num_scalar_prefetch=0,
            grid=grid,
            in_specs=[
                pl.BlockSpec((n_in, tb), lambda i: (0, i)),     # x tile (feat, batch)
                pl.BlockSpec(w_in.shape, lambda i: (0, 0)),     # W_in  (H, n_in)
                pl.BlockSpec(b_in.shape, lambda i: (0, 0)),     # b_in  (H, 1)
                pl.BlockSpec(w_h.shape, lambda i: (0, 0, 0)),   # stacked hidden W
                pl.BlockSpec(b_h.shape, lambda i: (0, 0, 0)),   # stacked hidden b
                pl.BlockSpec(w_out.shape, lambda i: (0, 0)),    # W_out (n_out, H)
                pl.BlockSpec(b_out.shape, lambda i: (0, 0)),    # b_out (n_out, 1)
            ],
            out_specs=pl.BlockSpec((n_out, tb), lambda i: (0, i)),
        ),
        compiler_params=pltpu.CompilerParams(
            dimension_semantics=("parallel",),
        ),
    )(xt, w_in, b_in, w_h, b_h, w_out, b_out)

    return out_t[:, :B].T


def init_fcn_params(key, n_input, n_output, n_hidden, n_layers):
    """PyTorch-style nn.Linear init (uniform(-1/sqrt(fan_in), 1/sqrt(fan_in))).
    Weights are stored in PyTorch's (out_features, in_features) layout, biases
    as (out_features, 1) so they broadcast over the batch (lane) axis."""
    # TODO(synk): N_LAYERS == 1 (empty fch) would need a kernel variant without
    # the stacked hidden-weight refs; not supported here.
    assert n_layers >= 2, "init_fcn_params requires N_LAYERS >= 2"

    def linear(key, fan_in, fan_out):
        kw, kb = jax.random.split(key)
        bound = 1.0 / jnp.sqrt(jnp.float32(fan_in))
        w = jax.random.uniform(kw, (fan_out, fan_in), jnp.float32, -bound, bound)
        b = jax.random.uniform(kb, (fan_out, 1), jnp.float32, -bound, bound)
        return w, b

    keys = jax.random.split(key, n_layers + 1)
    w_in, b_in = linear(keys[0], n_input, n_hidden)
    hidden_ws, hidden_bs = [], []
    for l in range(n_layers - 1):
        w, b = linear(keys[1 + l], n_hidden, n_hidden)
        hidden_ws.append(w)
        hidden_bs.append(b)
    w_h = jnp.stack(hidden_ws, axis=0)   # (n_layers-1, H, H)
    b_h = jnp.stack(hidden_bs, axis=0)   # (n_layers-1, H, 1)
    w_out, b_out = linear(keys[-1], n_hidden, n_output)
    return w_in, b_in, w_h, b_h, w_out, b_out


def fcn_reference(x, w_in, b_in, w_h, b_h, w_out, b_out):
    dot = functools.partial(jnp.dot, precision=jax.lax.Precision.HIGHEST)
    h = jnp.tanh(dot(x, w_in.T) + b_in.T)
    for l in range(w_h.shape[0]):
        h = jnp.tanh(dot(h, w_h[l].T) + b_h[l].T)
    return dot(h, w_out.T) + b_out.T


if __name__ == "__main__":
    # Shapes consistent with the module's usage: x.view(-1, 1) -> (B, 1).
    N_INPUT, N_OUTPUT, N_HIDDEN, N_LAYERS = 1, 1, 32, 3

    key = jax.random.PRNGKey(0)
    k_x, k_p = jax.random.split(key)
    params = init_fcn_params(k_p, N_INPUT, N_OUTPUT, N_HIDDEN, N_LAYERS)

    # Small lane-dense batch: B=256 -> tb=128, 2 grid steps (megacore-friendly).
    B = 256
    x = jax.random.normal(k_x, (B, N_INPUT), dtype=jnp.float32)
    out = jax.block_until_ready(fcn_forward(x, *params))
    ref = fcn_reference(x, *params)
    assert out.shape == (B, N_OUTPUT)
    assert jnp.allclose(out, ref, atol=1e-4, rtol=1e-4), "mismatch vs JAX reference"

    # Ragged batch exercises the zero-padding path.
    B2 = 200
    x2 = jax.random.normal(k_x, (B2, N_INPUT), dtype=jnp.float32)
    out2 = jax.block_until_ready(fcn_forward(x2, *params))
    ref2 = fcn_reference(x2, *params)
    assert out2.shape == (B2, N_OUTPUT)
    assert jnp.allclose(out2, ref2, atol=1e-4, rtol=1e-4), "mismatch (ragged batch)"

    print("KERNEL_OK")
</pallas_src>

<mosaic_0001>
module attributes {stable_mosaic.version = 11 : i64} {
  func.func @fcn_kernel(%arg0: i32, %arg1: memref<1x128xf32, #tpu.memory_space<vmem>>, %arg2: memref<32x1xf32, #tpu.memory_space<vmem>>, %arg3: memref<32x1xf32, #tpu.memory_space<vmem>>, %arg4: memref<2x32x32xf32, #tpu.memory_space<vmem>>, %arg5: memref<2x32x1xf32, #tpu.memory_space<vmem>>, %arg6: memref<1x32xf32, #tpu.memory_space<vmem>>, %arg7: memref<1x1xf32, #tpu.memory_space<vmem>>, %arg8: memref<1x128xf32, #tpu.memory_space<vmem>>) attributes {dimension_semantics = [#tpu.dimension_semantics<parallel>], iteration_bounds = array<i64: 2>, scalar_prefetch = 0 : i64, scratch_operands = 0 : i64, tpu.core_type = #tpu.core_type<tc>, window_params = [{transform_indices = @transform_0, window_bounds = array<i64: 1, 128>}, {pipeline_mode = #tpu.pipeline_mode<synchronous>, transform_indices = @transform_1, window_bounds = array<i64: 32, 1>}, {pipeline_mode = #tpu.pipeline_mode<synchronous>, transform_indices = @transform_2, window_bounds = array<i64: 32, 1>}, {pipeline_mode = #tpu.pipeline_mode<synchronous>, transform_indices = @transform_3, window_bounds = array<i64: 2, 32, 32>}, {pipeline_mode = #tpu.pipeline_mode<synchronous>, transform_indices = @transform_4, window_bounds = array<i64: 2, 32, 1>}, {pipeline_mode = #tpu.pipeline_mode<synchronous>, transform_indices = @transform_5, window_bounds = array<i64: 1, 32>}, {pipeline_mode = #tpu.pipeline_mode<synchronous>, transform_indices = @transform_6, window_bounds = array<i64: 1, 1>}, {transform_indices = @transform_7, window_bounds = array<i64: 1, 128>}]} {
    %c0 = arith.constant 0 : index
    %c0_0 = arith.constant 0 : index
    %0 = vector.load %arg1[%c0, %c0_0] : memref<1x128xf32, #tpu.memory_space<vmem>>, vector<1x128xf32>
    %c0_1 = arith.constant 0 : index
    %c0_2 = arith.constant 0 : index
    %1 = vector.load %arg2[%c0_1, %c0_2] : memref<32x1xf32, #tpu.memory_space<vmem>>, vector<32x1xf32>
    %2 = vector.broadcast %1 : vector<32x1xf32> to vector<32x128xf32>
    %3 = vector.broadcast %0 : vector<1x128xf32> to vector<32x128xf32>
    %4 = arith.mulf %2, %3 : vector<32x128xf32>
    %c0_3 = arith.constant 0 : index
    %c0_4 = arith.constant 0 : index
    %5 = vector.load %arg3[%c0_3, %c0_4] : memref<32x1xf32, #tpu.memory_space<vmem>>, vector<32x1xf32>
    %6 = vector.broadcast %5 : vector<32x1xf32> to vector<32x128xf32>
    %7 = arith.addf %4, %6 : vector<32x128xf32>
    %8 = math.tanh %7 : vector<32x128xf32>
    %c0_5 = arith.constant 0 : index
    %c0_6 = arith.constant 0 : index
    %c0_7 = arith.constant 0 : index
    %9 = vector.load %arg4[%c0_5, %c0_6, %c0_7] : memref<2x32x32xf32, #tpu.memory_space<vmem>>, vector<1x32x32xf32>
    %10 = vector.shape_cast %9 : vector<1x32x32xf32> to vector<32x32xf32>
    %cst = arith.constant dense<0.000000e+00> : vector<32x128xf32>
    %11 = tpu.matmul %10, %8, %cst {dimension_numbers = #tpu.dot_dimension_numbers<[1], [0], [0], [1], [0, 0, 1, 1], [], []>} : vector<32x32xf32>, vector<32x128xf32>, vector<32x128xf32> -> vector<32x128xf32>
    %c0_8 = arith.constant 0 : index
    %c0_9 = arith.constant 0 : index
    %c0_10 = arith.constant 0 : index
    %12 = vector.load %arg5[%c0_8, %c0_9, %c0_10] : memref<2x32x1xf32, #tpu.memory_space<vmem>>, vector<1x32x1xf32>
    %13 = vector.shape_cast %12 : vector<1x32x1xf32> to vector<32x1xf32>
    %14 = vector.broadcast %13 : vector<32x1xf32> to vector<32x128xf32>
    %15 = arith.addf %11, %14 : vector<32x128xf32>
    %16 = math.tanh %15 : vector<32x128xf32>
    %c1 = arith.constant 1 : index
    %c0_11 = arith.constant 0 : index
    %c0_12 = arith.constant 0 : index
    %17 = vector.load %arg4[%c1, %c0_11, %c0_12] : memref<2x32x32xf32, #tpu.memory_space<vmem>>, vector<1x32x32xf32>
    %18 = vector.shape_cast %17 : vector<1x32x32xf32> to vector<32x32xf32>
    %cst_13 = arith.constant dense<0.000000e+00> : vector<32x128xf32>
    %19 = tpu.matmul %18, %16, %cst_13 {dimension_numbers = #tpu.dot_dimension_numbers<[1], [0], [0], [1], [0, 0, 1, 1], [], []>} : vector<32x32xf32>, vector<32x128xf32>, vector<32x128xf32> -> vector<32x128xf32>
    %c1_14 = arith.constant 1 : index
    %c0_15 = arith.constant 0 : index
    %c0_16 = arith.constant 0 : index
    %20 = vector.load %arg5[%c1_14, %c0_15, %c0_16] : memref<2x32x1xf32, #tpu.memory_space<vmem>>, vector<1x32x1xf32>
    %21 = vector.shape_cast %20 : vector<1x32x1xf32> to vector<32x1xf32>
    %22 = vector.broadcast %21 : vector<32x1xf32> to vector<32x128xf32>
    %23 = arith.addf %19, %22 : vector<32x128xf32>
    %24 = math.tanh %23 : vector<32x128xf32>
    %c0_17 = arith.constant 0 : index
    %c0_18 = arith.constant 0 : index
    %25 = vector.load %arg6[%c0_17, %c0_18] : memref<1x32xf32, #tpu.memory_space<vmem>>, vector<1x32xf32>
    %cst_19 = arith.constant dense<0.000000e+00> : vector<1x128xf32>
    %26 = tpu.matmul %25, %24, %cst_19 {dimension_numbers = #tpu.dot_dimension_numbers<[1], [0], [0], [1], [0, 0, 1, 1], [], []>} : vector<1x32xf32>, vector<32x128xf32>, vector<1x128xf32> -> vector<1x128xf32>
    %c0_20 = arith.constant 0 : index
    %c0_21 = arith.constant 0 : index
    %27 = vector.load %arg7[%c0_20, %c0_21] : memref<1x1xf32, #tpu.memory_space<vmem>>, vector<1x1xf32>
    %28 = vector.broadcast %27 : vector<1x1xf32> to vector<1x128xf32>
    %29 = arith.addf %26, %28 : vector<1x128xf32>
    %c0_22 = arith.constant 0 : index
    %c0_23 = arith.constant 0 : index
    %30 = vector.load %arg8[%c0_22, %c0_23] : memref<1x128xf32, #tpu.memory_space<vmem>>, vector<1x128xf32>
    tpu.vector_store %arg8[%c0_22, %c0_23], %29 {strides = array<i32>} : memref<1x128xf32, #tpu.memory_space<vmem>>, vector<1x128xf32>,
    return
  }
  func.func @transform_0(%arg0: i32) -> (i32, i32) {
    %c0_i32 = arith.constant 0 : i32
    %c0_i32_0 = arith.constant 0 : i32
    return %c0_i32, %arg0 : i32, i32
  }
  func.func @transform_1(%arg0: i32) -> (i32, i32) {
    %c0_i32 = arith.constant 0 : i32
    %c0_i32_0 = arith.constant 0 : i32
    %c0_i32_1 = arith.constant 0 : i32
    return %c0_i32, %c0_i32_0 : i32, i32
  }
  func.func @transform_2(%arg0: i32) -> (i32, i32) {
    %c0_i32 = arith.constant 0 : i32
    %c0_i32_0 = arith.constant 0 : i32
    %c0_i32_1 = arith.constant 0 : i32
    return %c0_i32, %c0_i32_0 : i32, i32
  }
  func.func @transform_3(%arg0: i32) -> (i32, i32, i32) {
    %c0_i32 = arith.constant 0 : i32
    %c0_i32_0 = arith.constant 0 : i32
    %c0_i32_1 = arith.constant 0 : i32
    %c0_i32_2 = arith.constant 0 : i32
    return %c0_i32, %c0_i32_0, %c0_i32_1 : i32, i32, i32
  }
  func.func @transform_4(%arg0: i32) -> (i32, i32, i32) {
    %c0_i32 = arith.constant 0 : i32
    %c0_i32_0 = arith.constant 0 : i32
    %c0_i32_1 = arith.constant 0 : i32
    %c0_i32_2 = arith.constant 0 : i32
    return %c0_i32, %c0_i32_0, %c0_i32_1 : i32, i32, i32
  }
  func.func @transform_5(%arg0: i32) -> (i32, i32) {
    %c0_i32 = arith.constant 0 : i32
    %c0_i32_0 = arith.constant 0 : i32
    %c0_i32_1 = arith.constant 0 : i32
    return %c0_i32, %c0_i32_0 : i32, i32
  }
  func.func @transform_6(%arg0: i32) -> (i32, i32) {
    %c0_i32 = arith.constant 0 : i32
    %c0_i32_0 = arith.constant 0 : i32
    %c0_i32_1 = arith.constant 0 : i32
    return %c0_i32, %c0_i32_0 : i32, i32
  }
  func.func @transform_7(%arg0: i32) -> (i32, i32) {
    %c0_i32 = arith.constant 0 : i32
    %c0_i32_0 = arith.constant 0 : i32
    return %c0_i32, %arg0 : i32, i32
  }
}

</mosaic_0001>

<bundles_post_ra>
// kernel: fcn_forward.1
= control target key start
LH: loop header
LB: loop body
LE: loop exit
PB: predicated region body
PF: predicated region fallthrough
CT: control target
= control target key end

     0   :  { %s1189_s0 = inlined_call_operand.vmem [shape: f32[1,256], index: 0, kind: input, shape index: {}]   ;;  %s1190_s1 = inlined_call_operand.vmem [shape: f32[32,1], index: 1, kind: input, shape index: {}]   ;;  %s1191_s2 = inlined_call_operand.vmem [shape: f32[32,1], index: 2, kind: input, shape index: {}]   ;;  %s1192_s3 = inlined_call_operand.vmem [shape: f32[2,32,32], index: 3, kind: input, shape index: {}]   ;;  %s1193_s4 = inlined_call_operand.vmem [shape: f32[2,32,1], index: 4, kind: input, shape index: {}]   ;;  %s1194_s5 = inlined_call_operand.vmem [shape: f32[1,32], index: 5, kind: input, shape index: {}]   ;;  %s1195_s6 = inlined_call_operand.<no memory space> [shape: f32[1,1], index: 6, kind: input, shape index: {}]   ;;  %s1196_s7 = inlined_call_operand.hbm [shape: f32[1,256], index: 7, kind: output, shape index: {}]  }
   0x1   :  { %v12_v0 = vstv %s1195_s6 }
   0x2   :  { %13 = vst [vmem:[#allocation2] sm:$0x1] %v12_v0 }
   0x3   :  { %14 = vsyncpa [#allocation4], 0 }
   0x4   :  { %16 = vsyncpa [#allocation4 + $0x1], 0  ;;  %s1012_s26 = smov 0   ;;  %s1014_s27 = smov 0  }
   0x5   :  { %s1016_s28 = smov 0   ;;  %s1018_s29 = smov 0  }
   0x6 LB: > { %s1033_s6 = sadd.s32 4294967295, %s963_s29   ;;  %s750_s30 = sadd.s32 4294967294, %s963_s29   ;;  %s963_s29 = sphi %s1018_s29, %s1202_s29   ;;  %s959_s28 = sphi %s1016_s28, %s1201_s28   ;;  %s955_s27 = sphi %s1014_s27, %s1200_s27   ;;  %s951_s26 = sphi %s1012_s26, %s1199_s26  }
   0x7   : > { %s1037_s8 = sadd.s32 1, %s963_s29   ;;  %s181_s9 = sadd.s32 1, %s959_s28 }
   0x8   : > { %s178_s10 = ssub.s32 %s963_s29, %s1037_s8  ;;  %p191_p0 = scmp.ne.s32.totalorder %s959_s28, %s955_s27 }
   0x9   : > { %p179_p1 = scmp.eq.s32.totalorder %s178_s10, 0  ;;  %p192_p2 = scmp.eq.s32.totalorder %s1033_s6, 1 }
   0xa   : > { %p197_p3 = scmp.ne.s32.totalorder %s955_s27, %s951_s26  ;;  %p198_p4 = scmp.eq.s32.totalorder %s750_s30, 1 }
   0xb   : > { %s1048_s11 = scalar_select %p179_p1, %s959_s28, %s181_s9  }
   0xc   : > { %p1050_p5 = por %p192_p2, %p191_p0  ;;  %p1054_p6 = por %p198_p4, %p197_p3 }
   0xd   : > { %p753_p7 = scmp.ge.s32.totalorder %s963_s29, 1  ;;  %p240_p8 = scmp.lt.s32.totalorder %s963_s29, 3 }
   0xf   : > { %p241_p9 = pnand %p753_p7, %p240_p8 }
  0x10   : > { %p269_p10 = scmp.lt.s32.totalorder (!%p241_p9), %s1033_s6, 1  ;;  %s267_s23 = sand.u32 (!%p241_p9), 1, %s955_s27  }
  0x11   : > { %244 = sbr.rel (%p241_p9) target bundleno = 829 (0x33d), region = 48  ;;  %s772_s24 = sshll.u32 (!%p241_p9), %s1033_s6, 4 }
  0x12   : > { %s268_s25 = scalar_lea.vmem (!%p241_p9), [#allocation3], %s267_s23  ;;  %s1154_s14 = scalar_lea.hbm (!%p241_p9), %s1196_s7, %s772_s24 }
  0x13   : > { %s698_s30 = sshll.u32 (!%p241_p9), %s268_s25, 4  ;;  %s686_s15 = scalar_lea.sflag (!%p241_p9), [#allocation4], %s267_s23  ;;  %s699_s30 = int_to_ptr.vmem [resolvable:$true] %s698_s30 }
  0x14   : > { %s903_s16 = scalar_lea.vmem (!%p241_p9), %s699_s30, 16 }
  0x15   : > { %p904_p11 = scmp.ne.s32.totalorder (!%p241_p9), %s699_s30, %s903_s16 }
  0x16   : > { %v310_v1 = vld [vmem:[%s1191_s2 + $0x18] sm:$0xff]  ;;  %v965_v3 = vmov 0   ;;  %v275_v4 = vld [vmem:[%s1190_s1 + $0x10] sm:$0xff]  ;;  %v274_v5 = vld [vmem:[%s1190_s1 + $0x8] sm:$0xff]  ;;  %vm367_vm0 = vcmask 261120   ;;  %s270_s18 = scalar_select %p269_p10, %s1033_s6, 1 }
  0x17   : > { %v276_v2 = vld [vmem:[%s1190_s1 + $0x18] sm:$0xff]  ;;  %878 = vset.pattern.permute.xlu1 %v965_v3  ;;  %877 = vset.pattern.permute.xlu0 %v965_v3  ;;  %v309_v6 = vld [vmem:[%s1191_s2 + $0x10] sm:$0xff]  ;;  %v273_v7 = vld [vmem:[%s1190_s1] sm:$0xff]  ;;  %v966_v0 = vmov 0.0   ;;  %vm967_vm1 = vmmov 0   ;;  %p905_p12 = pnand %p904_p11, %p1050_p5  ;;  %s968_s6 = smov [#allocation3]  }
  0x18   : > { %328 = vperm.xlu1 %878, %v310_v1   ;;  %294 = vperm.xlu0 %877, %v276_v2   ;;  %v308_v8 = vld [vmem:[%s1191_s2 + $0x8] sm:$0xff]  ;;  %v307_v9 = vld [vmem:[%s1191_s2] sm:$0xff]  ;;  %v346_v10 = vld [vmem:[%s1193_s4 + $0x18] sm:$0xff]  ;;  %s271_s21 = scalar_lea.vmem %s1189_s0, %s270_s18  ;;  %s907_s17 = sshll.u32 %s968_s6, 4  ;;  %s908_s17 = int_to_ptr.vmem [resolvable:$false] %s907_s17 }
  0x19   : > { %v345_v11 = vld [vmem:[%s1193_s4 + $0x10] sm:$0xff]  ;;  %v344_v12 = vld [vmem:[%s1193_s4 + $0x8] sm:$0xff]  ;;  %v343_v13 = vld [vmem:[%s1193_s4] sm:$0xff]  ;;  %p906_p13 = pneg %p905_p12  ;;  %s909_s18 = scalar_lea.vmem %s908_s17, 32 }
  0x1a   : > { %v766_v14 = vld [vmem:[%s1193_s4 + $0x38] sm:$0xff]  ;;  %v765_v15 = vld [vmem:[%s1193_s4 + $0x30] sm:$0xff]  ;;  %v764_v16 = vld [vmem:[%s1193_s4 + $0x28] sm:$0xff]  ;;  %p910_p0 = scmp.lt.s32.totalorder %s699_s30, %s908_s17  ;;  %p911_p1 = scmp.lt.s32.totalorder %s909_s18, %s903_s16 }
  0x1b   : > { %v763_v17 = vld [vmem:[%s1193_s4 + $0x20] sm:$0xff]  ;;  %v340_v41 = vld [vmem:[%s1192_s3 + $0x8] sm:$0xff]  ;;  %v341_v42 = vld [vmem:[%s1192_s3 + $0x10] sm:$0xff] }
  0x1c   : > { %289 = vperm.xlu0 %877, %v275_v4   ;;  %284 = vperm.xlu1 %878, %v274_v5   ;;  %v339_v18 = vld [vmem:[%s1192_s3] sm:$0xff]  ;;  %v342_v43 = vld [vmem:[%s1192_s3 + $0x18] sm:$0xff]  ;;  %v760_v61 = vld [vmem:[%s1192_s3 + $0x28] sm:$0xff]  ;;  %p912_p2 = por %p911_p1, %p910_p0 }
  0x1d   : > { %804 = vmatprep.mubr.msk.f32.mxu0 %vm367_vm0, %v339_v18  ;;  %v601_v19 = vld [vmem:[#allocation2] sm:$0x1]  ;;  %v761_v62 = vld [vmem:[%s1192_s3 + $0x30] sm:$0xff]  ;;  %v762_v63 = vld [vmem:[%s1192_s3 + $0x38] sm:$0xff]  ;;  %v607_v18 = vlaneseq }
  0x1e   : > { %v754_v20 = vld [vmem:[%s271_s21] ss:$0 sm:$0xff]  ;;  %p913_p3 = pnand %p912_p2, %p906_p13 }
  0x1f   : > { %v759_v44 = vld [vmem:[%s1192_s3 + $0x20] sm:$0xff] }
  0x20   : > { %323 = vperm.xlu0 %877, %v309_v6   ;;  %279 = vperm.xlu1 %878, %v273_v7  }
  0x21   : > { %818 = vmatprep.mubr.msk.f32.mxu1 %vm367_vm0, %v759_v44 }
  0x24   : > { %318 = vperm.xlu0 %877, %v308_v8   ;;  %313 = vperm.xlu1 %878, %v307_v9  }
  0x28   : > { %364 = vperm.xlu0 %877, %v346_v10   ;;  %359 = vperm.xlu1 %878, %v345_v11  }
  0x2c   : > { %354 = vperm.xlu0 %877, %v344_v12   ;;  %349 = vperm.xlu1 %878, %v343_v13  }
  0x30   : > { %496 = vperm.xlu0 %877, %v766_v14   ;;  %491 = vperm.xlu1 %878, %v765_v15  }
  0x34   : > { %486 = vperm.xlu0 %877, %v764_v16   ;;  %481 = vperm.xlu1 %878, %v763_v17   ;;  %v600_v16 = vld [vmem:[%s1194_s5] sm:$0x1] }
  0x38   : > { %604 = vperm.xlu0 %877, %v601_v19   ;;  %v608_v19 = vshrl.u32 %v607_v18, 7 }
  0x93   : > { %v329_v21 = vpop.permute.xlu1 %328  ;;  %v295_v22 = vpop.permute.xlu0 %294 }
  0x94   : > { %v306_v23 = vmul.f32 %v754_v20, %v295_v22 }
  0x96   : > { %v334_v24 = vadd.f32 %v329_v21, %v306_v23 }
  0x97   : > { %v290_v25 = vpop.permute.xlu0 %289  ;;  %v285_v26 = vpop.permute.xlu1 %284 }
  0x98   : > { %879 = vtanh.f32 %v334_v24  ;;  %v305_v27 = vmul.f32 %v754_v20, %v290_v25  ;;  %v304_v31 = vmul.f32 %v754_v20, %v285_v26 }
  0x9b   : > { %v324_v28 = vpop.permute.xlu0 %323  ;;  %v280_v29 = vpop.permute.xlu1 %279 }
  0x9c   : > { %v333_v30 = vadd.f32 %v324_v28, %v305_v27  ;;  %v303_v32 = vmul.f32 %v754_v20, %v280_v29  ;;  %v609_v20 = vsub.s32 0, %v608_v19 }
  0x9e   : > { %881 = vtanh.f32 %v333_v30 }
  0x9f   : > { %v319_v33 = vpop.permute.xlu0 %318  ;;  %v314_v34 = vpop.permute.xlu1 %313 }
  0xa0   : > { %v332_v35 = vadd.f32 %v319_v33, %v304_v31  ;;  %v331_v36 = vadd.f32 %v314_v34, %v303_v32 }
  0xa2   : > { %883 = vtanh.f32 %v332_v35 }
  0xa3   : > { %885 = vtanh.f32 %v331_v36  ;;  %v365_v45 = vpop.permute.xlu0 %364  ;;  %v360_v47 = vpop.permute.xlu1 %359 }
  0xa5   : > { %v880_v37 = vpop.eup %879 }
  0xa6   : > { %796 = vmatprep.subr.mxu0 %v880_v37 }
  0xa7   : > { %797 = vmatpush3.msra.mxu0 %v880_v37  ;;  %v355_v51 = vpop.permute.xlu0 %354  ;;  %v350_v55 = vpop.permute.xlu1 %349 }
  0xab   : > { %v882_v38 = vpop.eup %881  ;;  %v497_v1 = vpop.permute.xlu0 %496 }
  0xac   : > { %798 = vmatprep.subr.mxu0 %v882_v38  ;;  %v492_v3 = vpop.permute.xlu1 %491 }
  0xad   : > { %799 = vmatpush3.msra.mxu0 %v882_v38 }
  0xaf   : > { %v884_v39 = vpop.eup %883  ;;  %v487_v7 = vpop.permute.xlu0 %486 }
  0xb0   : > { %800 = vmatprep.subr.mxu0 %v884_v39  ;;  %v886_v40 = vpop.eup %885  ;;  %v482_v11 = vpop.permute.xlu1 %481 }
  0xb1   : > { %801 = vmatpush3.msra.mxu0 %v884_v39 }
  0xb2   : > { %802 = vmatprep.subr.mxu0 %v886_v40 }
  0xb3   : > { %803 = vmatpush3.msra.mxu0 %v886_v40  ;;  %v605_v21 = vpop.permute.xlu0 %604 }
  0xb4   : > { %805 = vmatmul.mubr.msk.f32.vlgmr.msra.gmra.mxu0 %vm367_vm0, %v340_v41  ;;  %824 = vmatprep.subr.mxu0 %v966_v0  ;;  %v610_v22 = vrot.slane %v605_v21, %v609_v20 }
  0xb5   : > { %807 = vmatprep.mubr.msk.f32.mxu0 %vm367_vm0, %v341_v42 }
  0xb8   : > { %808 = vmatmul.mubr.msk.f32.gmra.mxu0 %vm367_vm0, %v342_v43 }
  0xb9   : > { %832 = vmatprep.mubr.msk.f32.mxu0 %vm967_vm1, %v966_v0 }
 0x174   : > { %v806_v46 = vpop.f32.mrf.mxu0 }
 0x175   : > { %v452_v53 = vadd.f32 %v806_v46, %v355_v51 }
 0x176   : > { %v446_v48 = vpop.f32.mrf.mxu0 }
 0x177   : > { %v447_v56 = vadd.f32 %v446_v48, %v350_v55 }
 0x178   : > { %v809_v49 = vpop.f32.mrf.mxu0 }
 0x179   : > { %v462_v50 = vadd.f32 %v809_v49, %v365_v45 }
 0x17a   : > { %v456_v52 = vpop.f32.mrf.mxu0 }
 0x17b   : > { %887 = vtanh.f32 %v462_v50  ;;  %v457_v54 = vadd.f32 %v456_v52, %v360_v47 }
 0x17d   : > { %889 = vtanh.f32 %v457_v54 }
 0x17e   : > { %891 = vtanh.f32 %v452_v53 }
 0x17f   : > { %893 = vtanh.f32 %v447_v56 }
 0x188   : > { %v888_v57 = vpop.eup %887 }
 0x189   : > { %810 = vmatprep.subr.mxu1 %v888_v57 }
 0x18a   : > { %v890_v58 = vpop.eup %889  ;;  %811 = vmatpush3.msra.mxu1 %v888_v57 }
 0x18b   : > { %812 = vmatprep.subr.mxu1 %v890_v58  ;;  %v892_v59 = vpop.eup %891 }
 0x18c   : > { %813 = vmatpush3.msra.mxu1 %v890_v58  ;;  %v894_v60 = vpop.eup %893 }
 0x18d   : > { %814 = vmatprep.subr.mxu1 %v892_v59 }
 0x18e   : > { %815 = vmatpush3.msra.mxu1 %v892_v59 }
 0x18f   : > { %816 = vmatprep.subr.mxu1 %v894_v60 }
 0x190   : > { %817 = vmatpush3.msra.mxu1 %v894_v60 }
 0x191   : > { %819 = vmatmul.mubr.msk.f32.vlgmr.msra.gmra.mxu1 %vm367_vm0, %v760_v61 }
 0x192   : > { %821 = vmatprep.mubr.msk.f32.mxu1 %vm367_vm0, %v761_v62 }
 0x195   : > { %822 = vmatmul.mubr.msk.f32.gmra.mxu1 %vm367_vm0, %v762_v63 }
 0x251   : > { %v820_v2 = vpop.f32.mrf.mxu1 }
 0x252   : > { %v583_v9 = vadd.f32 %v820_v2, %v487_v7 }
 0x253   : > { %v577_v4 = vpop.f32.mrf.mxu1 }
 0x254   : > { %v578_v12 = vadd.f32 %v577_v4, %v482_v11 }
 0x255   : > { %v823_v5 = vpop.f32.mrf.mxu1 }
 0x256   : > { %v593_v6 = vadd.f32 %v823_v5, %v497_v1 }
 0x257   : > { %v587_v8 = vpop.f32.mrf.mxu1 }
 0x258   : > { %895 = vtanh.f32 %v593_v6  ;;  %v588_v10 = vadd.f32 %v587_v8, %v492_v3 }
 0x25a   : > { %897 = vtanh.f32 %v588_v10 }
 0x25b   : > { %899 = vtanh.f32 %v583_v9 }
 0x25c   : > { %901 = vtanh.f32 %v578_v12 }
 0x265   : > { %v896_v13 = vpop.eup %895 }
 0x266   : > { %825 = vmatpush3.msra.mxu0 %v896_v13 }
 0x267   : > { %v898_v14 = vpop.eup %897  ;;  %826 = vmatprep.subr.mxu0 %v966_v0 }
 0x268   : > { %827 = vmatpush3.msra.mxu0 %v898_v14  ;;  %v900_v15 = vpop.eup %899 }
 0x269   : > { %828 = vmatprep.subr.mxu0 %v966_v0  ;;  %v902_v17 = vpop.eup %901 }
 0x26a   : > { %829 = vmatpush3.msra.mxu0 %v900_v15 }
 0x26b   : > { %830 = vmatprep.subr.mxu0 %v966_v0 }
 0x26c   : > { %831 = vmatpush3.msra.mxu0 %v902_v17 }
 0x26d   : > { %833 = vmatmul.mubr.msk.f32.vlgmr.msra.gmra.mxu0 %vm367_vm0, %v600_v16 }
 0x32d   : > { %v680_v23 = vpop.f32.mrf.mxu0 }
 0x32e   : > { %v681_v24 = vadd.f32 %v680_v23, %v610_v22 }
 0x32f   : > { %v834_v25 = vpop.f32.mrf.mxu0 }
 0x330   : > { %684 = vst [vmem:[%s268_s25] sm:$0x1] %v681_v24 }
 0x331   : > { %916 = shalt.err (!%p913_p3)
}
 0x332   : > { %s917_s19 = scalar_lea.hbm %s1154_s14, 16  ;;  %s921_s22 = scalar_lea.hbm %s1196_s7, 32 }
 0x333   : > { %p918_p4 = scmp.ne.s32.totalorder %s1154_s14, %s917_s19  ;;  %p922_p9 = scmp.lt.s32.totalorder %s1154_s14, %s1196_s7 }
 0x334   : > { %p923_p10 = scmp.lt.s32.totalorder %s921_s22, %s917_s19 }
 0x335   : > { %p919_p7 = pnand %p918_p4, %p1050_p5 }
 0x336   : > { %p924_p11 = por %p923_p10, %p922_p9 }
 0x337   : > { %p920_p8 = pneg %p919_p7 }
 0x339   : > { %p925_p12 = pnand %p924_p11, %p920_p8 }
 0x33b   : > { %928 = shalt.err (!%p925_p12)
}
 0x33c   : > { %835 = dma.vmem_to_hbm [thread:$0]  (%p1050_p5), %s699_s30, 16, %s1154_s14, %s686_s15  }
 0x33d PF: > { %p841_p13 = scmp.ge.s32.totalorder %s963_s29, 2  ;;  %s710_s25 = sand.u32 1, %s951_s26  }
 0x33e   : > { %s711_s9 = scalar_lea.sflag [#allocation4], %s710_s25 }
 0x33f   : > { %p838_p0 = pnand %p841_p13, %p1054_p6 }
 0x341   : > { %p839_p1 = pneg %p838_p0 }
 0x343   : > { %946 = dma.done.wait (%p839_p1), %s711_s9, 16  }
 0x344   : > { %948 = vsyncadd (%p839_p1), %s711_s9, 4294967280  ;;  %p19_p2 = scmp.ge.s32.totalorder %s1037_s8, 4   ;;  %s1199_s26 = smov %s955_s27 }
 0x345   : > { %s1200_s27 = smov %s959_s28  ;;  %s1201_s28 = smov %s1048_s11 }
 0x346   : > { %s1202_s29 = smov %s1037_s8  ;;  %21 = sbr.rel (!%p19_p2) target bundleno = 6 (0x6), region = 85 }
 0x34b   :  { %715 = vsyncpa [#allocation4], 1 }
 0x34c   :  { %717 = vsyncpa [#allocation4 + $0x1], 1 }

</bundles_post_ra>
